<compile_context>
chip_gen: v7x
topology: tpu7x:2x2x1
jax: 0.10.0
libtpu: 0.0.40
codegen_flags: <defaults>
</compile_context>

<pallas_src>
import jax
import jax.numpy as jnp
from jax.experimental import pallas as pl
from jax.experimental.pallas import tpu as pltpu


def _vae_fused_kernel(x_ref, we_ref, be_ref, eps_ref, wd_ref, bd_ref,
                      g1_ref, g2_ref, packed_ref, probs_ref):
    rank = wd_ref.shape[0]

    # Encoder: one lane-dense matmul against the (F, round128(2*rank)) padded
    # weight; mu / log_scale are free static lane slices of the result.
    x = x_ref[...]                                                  # (Bt, F)
    z_params = jnp.dot(x, we_ref[...],
                       preferred_element_type=jnp.float32) + be_ref[...]
    z_mu = z_params[:, :rank]                                       # (Bt, rank)
    z_scale = jnp.exp(z_params[:, rank:2 * rank])

    # Reparameterized sample from N(z_mu, z_scale)  (zdist.sample()).
    z = z_mu + z_scale * eps_ref[:, :rank]

    # Decoder linear: logits = z @ Wd + bd  (lane-dense, (Bt, F)).
    logits = jnp.dot(z, wd_ref[...],
                     preferred_element_type=jnp.float32) + bd_ref[...]

    # Grouped softmax (== softmax over axis=2 of the (B, L, A) reshape), done
    # lane-dense.  The row-global max is the same constant for every lane of
    # a row, so subtracting it is exact per group.  Per-group sums come from
    # the factored segment matmuls e @ G1 (F,L) and inv @ G2 (L,F); the
    # divide becomes L reciprocals/row on the EUP plus one VPU multiply.
    m = jnp.max(logits, axis=-1, keepdims=True)
    e = jnp.exp(logits - m)
    gsum = jnp.dot(e, g1_ref[...], preferred_element_type=jnp.float32)  # (Bt, L)
    # TODO(synk): a true per-group max would remove the (extremely unlikely)
    # all-underflowed-group case entirely; the floor below only prevents NaN.
    inv = pl.reciprocal(jnp.maximum(gsum, 1e-30), approx=False)         # (Bt, L)
    probs = e * jnp.dot(inv, g2_ref[...], preferred_element_type=jnp.float32)
    probs_ref[...] = probs.astype(probs_ref.dtype)

    # Pack z | z_mu | z_scale (+ zero pad to a 128-lane multiple) into one
    # lane-dense output -> a single wide store / single output pipeline.
    bt = z.shape[0]
    pad = packed_ref.shape[-1] - 3 * rank
    pieces = [z, z_mu, z_scale]
    if pad > 0:
        pieces.append(jnp.zeros((bt, pad), jnp.float32))
    packed_ref[...] = jnp.concatenate(pieces, axis=-1)


def vae_forward(x, params, eps, *, block_b=None, probs_dtype=jnp.float32):
    """x: (B, L, A) float32; eps: (B, rank) standard-normal noise.

    params: we (F, 2*rank), be (1, 2*rank), wd (rank, F), bd (1, F).
    Returns (zsample, (z_mu, z_scale), xprobs) with xprobs shaped (B, L, A).
    """
    B, L, A = x.shape
    F = L * A
    rank = params["wd"].shape[0]

    xf = x.reshape(B, F)

    # Batch tile: large (amortizes the ~0.35us/step pipeline overhead and
    # approaches HBM roofline) but sized to ~half the batch so the grid keeps
    # >= 2 "parallel" steps for v7x's two TensorCores.  Capped at 1024 rows.
    if block_b is None:
        half = (((B + 1) // 2) + 7) // 8 * 8
        block_b = max(8, min(1024, half))
    assert block_b % 8 == 0

    # Pad batch to a multiple of the tile (padded rows are discarded below).
    Bp = ((B + block_b - 1) // block_b) * block_b
    grid = (Bp // block_b,)

    # Lane widths, all padded up to multiples of 128 (lane-dense I/O).
    we_w = ((2 * rank + 127) // 128) * 128       # encoder output lanes
    eps_w = ((rank + 127) // 128) * 128          # eps lanes
    packed_w = ((3 * rank + 127) // 128) * 128   # z | mu | scale lanes

    if Bp != B:
        xf = jnp.pad(xf, ((0, Bp - B), (0, 0)))
    eps_in = jnp.pad(eps, ((0, Bp - B), (0, eps_w - rank)))
    we_in = jnp.pad(params["we"], ((0, 0), (0, we_w - 2 * rank)))
    be_in = jnp.pad(params["be"], ((0, 0), (0, we_w - 2 * rank)))

    # Factored 0/1 segment indicators for the grouped-softmax denominator:
    # G1[i, l] = 1 iff i // A == l;  G2 = G1.T.   (F*L + L*F floats, linear
    # in F instead of the previous quadratic (F, F) indicator.)
    gidx = jnp.arange(F) // A
    g1 = (gidx[:, None] == jnp.arange(L)[None, :]).astype(jnp.float32)  # (F, L)
    g2 = g1.T                                                           # (L, F)

    def blocked(shape):
        return pl.BlockSpec(shape, lambda i: (i, 0))

    def resident(shape):
        return pl.BlockSpec(shape, lambda i: (0, 0))

    # Explicit scoped-VMEM budget sized from the actual tiles (with headroom),
    # clamped to [32 MiB, 64 MiB] so it is valid on v5e/v6e/v7x.
    def _f32_bytes(*shape):
        n = 4
        for s in shape:
            n *= s
        return n

    stream_bytes = 2 * (2 * _f32_bytes(block_b, F)            # x + probs tiles
                        + _f32_bytes(block_b, eps_w)
                        + _f32_bytes(block_b, packed_w))
    resident_bytes = 2 * (_f32_bytes(F, we_w) + _f32_bytes(1, we_w)
                          + _f32_bytes(rank, F) + _f32_bytes(1, F)
                          + _f32_bytes(F, L) + _f32_bytes(L, F))
    vmem_limit = int(max(32 << 20,
                         min(64 << 20, 2 * (stream_bytes + resident_bytes))))

    packed, probs = pl.pallas_call(
        _vae_fused_kernel,
        grid=grid,
        in_specs=[blocked((block_b, F)),            # x tile
                  resident((F, we_w)),              # encoder weight (padded)
                  resident((1, we_w)),              # encoder bias (padded)
                  blocked((block_b, eps_w)),        # eps tile (lane-dense)
                  resident((rank, F)),              # decoder weight
                  resident((1, F)),                 # decoder bias
                  resident((F, L)),                 # softmax segment G1
                  resident((L, F))],                # softmax segment G2
        out_specs=[blocked((block_b, packed_w)),    # packed z | mu | scale
                   blocked((block_b, F))],          # xprobs (lane-dense)
        out_shape=[jax.ShapeDtypeStruct((Bp, packed_w), jnp.float32),
                   jax.ShapeDtypeStruct((Bp, F), probs_dtype)],
        compiler_params=pltpu.CompilerParams(
            dimension_semantics=("parallel",),
            vmem_limit_bytes=vmem_limit),
    )(xf, we_in, be_in, eps_in, params["wd"], params["bd"], g1, g2)

    z = packed[:B, :rank]
    z_mu = packed[:B, rank:2 * rank]
    z_scale = packed[:B, 2 * rank:3 * rank]
    xprobs = probs[:B].reshape(B, L, A)

    # (zsample, zdist params, Categorical probs of x | z)
    return z, (z_mu, z_scale), xprobs


if __name__ == "__main__":
    B, L, A, rank = 16, 8, 16, 32
    F = L * A

    key = jax.random.PRNGKey(0)
    ks = jax.random.split(key, 6)

    x = jax.random.uniform(ks[0], (B, L, A), jnp.float32)

    # Deterministic parameter init (torch.nn.Linear-style uniform bounds).
    bound_e = 1.0 / float(F) ** 0.5
    we = jax.random.uniform(ks[1], (F, 2 * rank), jnp.float32, -bound_e, bound_e)
    be = jax.random.uniform(ks[2], (1, 2 * rank), jnp.float32, -bound_e, bound_e)
    bound_d = 1.0 / float(rank) ** 0.5
    wd = jax.random.uniform(ks[3], (rank, F), jnp.float32, -bound_d, bound_d)
    bd = jax.random.uniform(ks[4], (1, F), jnp.float32, -bound_d, bound_d)
    eps = jax.random.normal(ks[5], (B, rank), jnp.float32)

    params = dict(we=we, be=be, wd=wd, bd=bd)

    # Default block_b -> 8 rows/tile here, grid of 2 "parallel" steps.
    z, (z_mu, z_scale), xprobs = vae_forward(x, params, eps)
    jax.block_until_ready((z, z_mu, z_scale, xprobs))

    # Pure-JAX reference check of the forward pass.
    xf = x.reshape(B, F)
    zp = xf @ we + be
    rmu, rls = zp[:, :rank], zp[:, rank:]
    rscale = jnp.exp(rls)
    rz = rmu + rscale * eps
    rlogits = rz @ wd + bd
    rprobs = jax.nn.softmax(rlogits.reshape(B, L, A), axis=2)

    assert jnp.allclose(z, rz, atol=1e-5), "zsample mismatch"
    assert jnp.allclose(z_mu, rmu, atol=1e-5), "z_mu mismatch"
    assert jnp.allclose(z_scale, rscale, atol=1e-5), "z_scale mismatch"
    assert jnp.allclose(xprobs, rprobs, atol=1e-5), "xprobs mismatch"
    assert jnp.allclose(xprobs.sum(axis=2), 1.0, atol=1e-5)

    print("KERNEL_OK")
</pallas_src>

<mosaic_0001>
module attributes {stable_mosaic.version = 11 : i64} {
  func.func @_vae_fused_kernel(%arg0: i32, %arg1: memref<8x128xf32, #tpu.memory_space<vmem>>, %arg2: memref<128x128xf32, #tpu.memory_space<vmem>>, %arg3: memref<1x128xf32, #tpu.memory_space<vmem>>, %arg4: memref<8x128xf32, #tpu.memory_space<vmem>>, %arg5: memref<32x128xf32, #tpu.memory_space<vmem>>, %arg6: memref<1x128xf32, #tpu.memory_space<vmem>>, %arg7: memref<128x8xf32, #tpu.memory_space<vmem>>, %arg8: memref<8x128xf32, #tpu.memory_space<vmem>>, %arg9: memref<8x128xf32, #tpu.memory_space<vmem>>, %arg10: memref<8x128xf32, #tpu.memory_space<vmem>>) attributes {dimension_semantics = [#tpu.dimension_semantics<parallel>], iteration_bounds = array<i64: 2>, scalar_prefetch = 0 : i64, scratch_operands = 0 : i64, tpu.core_type = #tpu.core_type<tc>, window_params = [{transform_indices = @transform_0, window_bounds = array<i64: 8, 128>}, {pipeline_mode = #tpu.pipeline_mode<synchronous>, transform_indices = @transform_1, window_bounds = array<i64: 128, 128>}, {pipeline_mode = #tpu.pipeline_mode<synchronous>, transform_indices = @transform_2, window_bounds = array<i64: 1, 128>}, {transform_indices = @transform_3, window_bounds = array<i64: 8, 128>}, {pipeline_mode = #tpu.pipeline_mode<synchronous>, transform_indices = @transform_4, window_bounds = array<i64: 32, 128>}, {pipeline_mode = #tpu.pipeline_mode<synchronous>, transform_indices = @transform_5, window_bounds = array<i64: 1, 128>}, {pipeline_mode = #tpu.pipeline_mode<synchronous>, transform_indices = @transform_6, window_bounds = array<i64: 128, 8>}, {pipeline_mode = #tpu.pipeline_mode<synchronous>, transform_indices = @transform_7, window_bounds = array<i64: 8, 128>}, {transform_indices = @transform_8, window_bounds = array<i64: 8, 128>}, {transform_indices = @transform_9, window_bounds = array<i64: 8, 128>}]} {
    %c0 = arith.constant 0 : index
    %c0_0 = arith.constant 0 : index
    %0 = vector.load %arg1[%c0, %c0_0] : memref<8x128xf32, #tpu.memory_space<vmem>>, vector<8x128xf32>
    %c0_1 = arith.constant 0 : index
    %c0_2 = arith.constant 0 : index
    %1 = vector.load %arg2[%c0_1, %c0_2] : memref<128x128xf32, #tpu.memory_space<vmem>>, vector<128x128xf32>
    %cst = arith.constant dense<0.000000e+00> : vector<8x128xf32>
    %2 = tpu.matmul %0, %1, %cst {dimension_numbers = #tpu.dot_dimension_numbers<[1], [0], [0], [1], [0, 0, 1, 1], [], []>} : vector<8x128xf32>, vector<128x128xf32>, vector<8x128xf32> -> vector<8x128xf32>
    %c0_3 = arith.constant 0 : index
    %c0_4 = arith.constant 0 : index
    %3 = vector.load %arg3[%c0_3, %c0_4] : memref<1x128xf32, #tpu.memory_space<vmem>>, vector<1x128xf32>
    %4 = vector.broadcast %3 : vector<1x128xf32> to vector<8x128xf32>
    %5 = arith.addf %2, %4 : vector<8x128xf32>
    %6 = vector.extract_strided_slice %5 {offsets = [0, 0], sizes = [8, 32], strides = [1, 1]} : vector<8x128xf32> to vector<8x32xf32>
    %7 = vector.extract_strided_slice %5 {offsets = [0, 32], sizes = [8, 32], strides = [1, 1]} : vector<8x128xf32> to vector<8x32xf32>
    %8 = math.exp %7 : vector<8x32xf32>
    %c0_5 = arith.constant 0 : index
    %c0_6 = arith.constant 0 : index
    %9 = vector.load %arg4[%c0_5, %c0_6] : memref<8x128xf32, #tpu.memory_space<vmem>>, vector<8x32xf32>
    %10 = arith.mulf %8, %9 : vector<8x32xf32>
    %11 = arith.addf %6, %10 : vector<8x32xf32>
    %c0_7 = arith.constant 0 : index
    %c0_8 = arith.constant 0 : index
    %12 = vector.load %arg5[%c0_7, %c0_8] : memref<32x128xf32, #tpu.memory_space<vmem>>, vector<32x128xf32>
    %cst_9 = arith.constant dense<0.000000e+00> : vector<8x128xf32>
    %13 = tpu.matmul %11, %12, %cst_9 {dimension_numbers = #tpu.dot_dimension_numbers<[1], [0], [0], [1], [0, 0, 1, 1], [], []>} : vector<8x32xf32>, vector<32x128xf32>, vector<8x128xf32> -> vector<8x128xf32>
    %c0_10 = arith.constant 0 : index
    %c0_11 = arith.constant 0 : index
    %14 = vector.load %arg6[%c0_10, %c0_11] : memref<1x128xf32, #tpu.memory_space<vmem>>, vector<1x128xf32>
    %15 = vector.broadcast %14 : vector<1x128xf32> to vector<8x128xf32>
    %16 = arith.addf %13, %15 : vector<8x128xf32>
    %cst_12 = arith.constant dense<0xFF800000> : vector<8xf32>
    %17 = vector.multi_reduction <maximumf>, %16, %cst_12 [1] : vector<8x128xf32> to vector<8xf32>
    %18 = vector.shape_cast %17 : vector<8xf32> to vector<8x1xf32>
    %19 = vector.broadcast %18 : vector<8x1xf32> to vector<8x128xf32>
    %20 = arith.subf %16, %19 : vector<8x128xf32>
    %21 = math.exp %20 : vector<8x128xf32>
    %c0_13 = arith.constant 0 : index
    %c0_14 = arith.constant 0 : index
    %22 = vector.load %arg7[%c0_13, %c0_14] : memref<128x8xf32, #tpu.memory_space<vmem>>, vector<128x8xf32>
    %cst_15 = arith.constant dense<0.000000e+00> : vector<8x8xf32>
    %23 = tpu.matmul %21, %22, %cst_15 {dimension_numbers = #tpu.dot_dimension_numbers<[1], [0], [0], [1], [0, 0, 1, 1], [], []>} : vector<8x128xf32>, vector<128x8xf32>, vector<8x8xf32> -> vector<8x8xf32>
    %cst_16 = arith.constant 1.000000e-30 : f32
    %24 = vector.broadcast %cst_16 : f32 to vector<8x8xf32>
    %25 = arith.maximumf %23, %24 : vector<8x8xf32>
    %26 = tpu.reciprocal %25 : vector<8x8xf32> -> vector<8x8xf32>
    %c0_17 = arith.constant 0 : index
    %c0_18 = arith.constant 0 : index
    %27 = vector.load %arg8[%c0_17, %c0_18] : memref<8x128xf32, #tpu.memory_space<vmem>>, vector<8x128xf32>
    %cst_19 = arith.constant dense<0.000000e+00> : vector<8x128xf32>
    %28 = tpu.matmul %26, %27, %cst_19 {dimension_numbers = #tpu.dot_dimension_numbers<[1], [0], [0], [1], [0, 0, 1, 1], [], []>} : vector<8x8xf32>, vector<8x128xf32>, vector<8x128xf32> -> vector<8x128xf32>
    %29 = arith.mulf %21, %28 : vector<8x128xf32>
    %c0_20 = arith.constant 0 : index
    %c0_21 = arith.constant 0 : index
    %30 = vector.load %arg10[%c0_20, %c0_21] : memref<8x128xf32, #tpu.memory_space<vmem>>, vector<8x128xf32>
    tpu.vector_store %arg10[%c0_20, %c0_21], %29 {strides = array<i32>} : memref<8x128xf32, #tpu.memory_space<vmem>>, vector<8x128xf32>,
    %cst_22 = arith.constant 0.000000e+00 : f32
    %31 = vector.broadcast %cst_22 : f32 to vector<8x32xf32>
    %32 = tpu.concatenate %11, %6, %8, %31 in 1 : vector<8x32xf32>, vector<8x32xf32>, vector<8x32xf32>, vector<8x32xf32> -> vector<8x128xf32>
    %c0_23 = arith.constant 0 : index
    %c0_24 = arith.constant 0 : index
    %33 = vector.load %arg9[%c0_23, %c0_24] : memref<8x128xf32, #tpu.memory_space<vmem>>, vector<8x128xf32>
    tpu.vector_store %arg9[%c0_23, %c0_24], %32 {strides = array<i32>} : memref<8x128xf32, #tpu.memory_space<vmem>>, vector<8x128xf32>,
    return
  }
  func.func @transform_0(%arg0: i32) -> (i32, i32) {
    %c0_i32 = arith.constant 0 : i32
    %c0_i32_0 = arith.constant 0 : i32
    return %arg0, %c0_i32 : i32, i32
  }
  func.func @transform_1(%arg0: i32) -> (i32, i32) {
    %c0_i32 = arith.constant 0 : i32
    %c0_i32_0 = arith.constant 0 : i32
    %c0_i32_1 = arith.constant 0 : i32
    return %c0_i32, %c0_i32_0 : i32, i32
  }
  func.func @transform_2(%arg0: i32) -> (i32, i32) {
    %c0_i32 = arith.constant 0 : i32
    %c0_i32_0 = arith.constant 0 : i32
    %c0_i32_1 = arith.constant 0 : i32
    return %c0_i32, %c0_i32_0 : i32, i32
  }
  func.func @transform_3(%arg0: i32) -> (i32, i32) {
    %c0_i32 = arith.constant 0 : i32
    %c0_i32_0 = arith.constant 0 : i32
    return %arg0, %c0_i32 : i32, i32
  }
  func.func @transform_4(%arg0: i32) -> (i32, i32) {
    %c0_i32 = arith.constant 0 : i32
    %c0_i32_0 = arith.constant 0 : i32
    %c0_i32_1 = arith.constant 0 : i32
    return %c0_i32, %c0_i32_0 : i32, i32
  }
  func.func @transform_5(%arg0: i32) -> (i32, i32) {
    %c0_i32 = arith.constant 0 : i32
    %c0_i32_0 = arith.constant 0 : i32
    %c0_i32_1 = arith.constant 0 : i32
    return %c0_i32, %c0_i32_0 : i32, i32
  }
  func.func @transform_6(%arg0: i32) -> (i32, i32) {
    %c0_i32 = arith.constant 0 : i32
    %c0_i32_0 = arith.constant 0 : i32
    %c0_i32_1 = arith.constant 0 : i32
    return %c0_i32, %c0_i32_0 : i32, i32
  }
  func.func @transform_7(%arg0: i32) -> (i32, i32) {
    %c0_i32 = arith.constant 0 : i32
    %c0_i32_0 = arith.constant 0 : i32
    %c0_i32_1 = arith.constant 0 : i32
    return %c0_i32, %c0_i32_0 : i32, i32
  }
  func.func @transform_8(%arg0: i32) -> (i32, i32) {
    %c0_i32 = arith.constant 0 : i32
    %c0_i32_0 = arith.constant 0 : i32
    return %arg0, %c0_i32 : i32, i32
  }
  func.func @transform_9(%arg0: i32) -> (i32, i32) {
    %c0_i32 = arith.constant 0 : i32
    %c0_i32_0 = arith.constant 0 : i32
    return %arg0, %c0_i32 : i32, i32
  }
}

</mosaic_0001>

<bundles_post_ra>
// kernel: tpu_custom_call.1
= control target key start
LH: loop header
LB: loop body
LE: loop exit
PB: predicated region body
PF: predicated region fallthrough
CT: control target
= control target key end

     0   :  { %15 = vsyncpa [#allocation3], 0  ;;  %s1796_s0 = inlined_call_operand.hbm [shape: f32[16,128], index: 0, kind: input, shape index: {}]   ;;  %s1797_s1 = inlined_call_operand.vmem [shape: f32[128,128], index: 1, kind: input, shape index: {}]   ;;  %s1798_s2 = inlined_call_operand.vmem [shape: f32[1,128], index: 2, kind: input, shape index: {}]   ;;  %s1799_s3 = inlined_call_operand.vmem [shape: f32[16,128], index: 3, kind: input, shape index: {}]   ;;  %s1800_s4 = inlined_call_operand.hbm [shape: f32[32,128], index: 4, kind: input, shape index: {}]   ;;  %s1801_s5 = inlined_call_operand.vmem [shape: f32[1,128], index: 5, kind: input, shape index: {}]   ;;  %s1802_s6 = inlined_call_operand.vmem [shape: f32[128,8], index: 6, kind: input, shape index: {}]   ;;  %s1803_s7 = inlined_call_operand.vmem [shape: f32[8,128], index: 7, kind: input, shape index: {}]   ;;  %s1804_s8 = inlined_call_operand.hbm [shape: f32[16,128], index: 8, kind: output, shape index: {0}]   ;;  %s1805_s9 = inlined_call_operand.hbm [shape: f32[16,128], index: 9, kind: output, shape index: {1}]  }
   0x1   :  { %17 = vsyncpa [#allocation3 + $0x1], 0 }
   0x2   :  { %18 = vsyncpa [#allocation6], 0 }
   0x3   :  { %19 = vsyncpa [#allocation4], 0 }
   0x4   :  { %21 = vsyncpa [#allocation4 + $0x1], 0 }
   0x5   :  { %22 = vsyncpa [#allocation9], 0 }
   0x6   :  { %24 = vsyncpa [#allocation9 + $0x1], 0  ;;  %s1424_s30 = smov 0   ;;  %s1426_s10 = smov 0  }
   0x7   :  { %s1428_s11 = smov 0   ;;  %s1430_s12 = smov 0  }
   0x8 LB: > { %s1445_s13 = sadd.s32 4294967295, %s1361_s12   ;;  %s923_s14 = sadd.s32 4294967294, %s1361_s12   ;;  %s1361_s12 = sphi %s1430_s12, %s1829_s12   ;;  %s1357_s11 = sphi %s1428_s11, %s1832_s11   ;;  %s1353_s10 = sphi %s1426_s10, %s1831_s10   ;;  %s1349_s30 = sphi %s1424_s30, %s1830_s30  }
   0x9   : > { %p50_p0 = scmp.ne.s32.totalorder %s1353_s10, %s1349_s30  ;;  %p1806_p1 = scmp.eq.s32.totalorder %s1445_s13, 0 }
   0xa   : > { %p232_p3 = scmp.eq.s32.totalorder %s923_s14, 1  ;;  %p924_p5 = scmp.ge.s32.totalorder %s1361_s12, 1 }
   0xb   : > { %p1454_p4 = por %p1806_p1, %p50_p0  ;;  %p265_p7 = scmp.lt.s32.totalorder %s1361_s12, 3 }
   0xc   : > { %p1459_p6 = por %p232_p3, %p50_p0  ;;  %s1363_s18 = smov [#allocation5]  }
   0xd   : > { %s1812_s15 = scalar_select %p1454_p4, 1, 0 }
   0xe   : > { %s1813_s16 = scalar_select %p1459_p6, 1, 0 }
   0xf   : > { %p1464_p8 = pnand %p924_p5, %p265_p7  ;;  %s283_s19 = sshll.u32 %s1363_s18, 4  ;;  %s1468_s19 = int_to_ptr.vmem [resolvable:$true] %s283_s19 }
  0x10   : > { %1814 = sst [smem:[#allocation14_spill]] %s1813_s16  ;;  %s1480_s21 = sadd.s32 1, %s1361_s12  }
  0x11   : > { %s1815_s17 = scalar_select %p1464_p8, 1, 0 }
  0x12   : > { %p1136_p9 = pneg %p1464_p8  ;;  %1817 = sst [smem:[#allocation15_spill]] %s1480_s21 }
  0x13   : > { %s37_s22 = sadd.s32 1, %s1357_s11  ;;  %s34_s23 = ssub.s32 %s1361_s12, %s1480_s21 }
  0x14   : > { %p1475_p11 = pnand %p1136_p9, %p1806_p1  ;;  %s1201_s26 = scalar_lea.hbm %s1800_s4, 512 }
  0x15   : > { %p1202_p12 = scmp.ne.s32.totalorder %s1800_s4, %s1201_s26  ;;  %p1208_p5 = scmp.lt.u32.totalorder %s1201_s26, %s1800_s4 }
  0x16   : > { %p1203_p13 = pneg %p1475_p11 }
  0x18   : > { %p1204_p0 = pnand %p1203_p13, %p1202_p12 }
  0x1a   : > { %p1205_p3 = pneg %p1204_p0 }
  0x1c   : > { %p1210_p7 = pnand %p1208_p5, %p1205_p3 }
  0x1e   : > { %1213 = shalt.err (!%p1210_p7)
}
  0x1f   : > { %s1214_s18 = scalar_lea.vmem %s1468_s19, 512  ;;  %p1222_p2 = scmp.lt.s32.totalorder %s1468_s19, %s1468_s19 }
  0x20   : > { %p1215_p9 = scmp.ne.s32.totalorder %s1468_s19, %s1214_s18  ;;  %p1223_p6 = scmp.lt.s32.totalorder %s1214_s18, %s1214_s18 }
  0x22   : > { %p1217_p10 = pnand %p1215_p9, %p1203_p13  ;;  %p1224_p4 = por %p1223_p6, %p1222_p2 }
  0x24   : > { %p1218_p1 = pneg %p1217_p10 }
  0x26   : > { %p1225_p8 = pnand %p1224_p4, %p1218_p1 }
  0x28   : > { %1228 = shalt.err (!%p1225_p8)
}
  0x29   : > { %s1364_s24 = smov 128   ;;  %s1365_s25 = smov 8  }
  0x2a   : > { %1139 = dma.hbm_to_vmem [thread:$0]  (!%p1475_p11), %s1800_s4, 512, %s1468_s19, [#allocation6], %s1364_s24, %s1364_s24, %s1365_s25  }
  0x2b   : > { %p35_p2 = scmp.eq.s32.totalorder %s34_s23, 0  ;;  %p44_p1 = scmp.ne.s32.totalorder %s1357_s11, %s1353_s10 }
  0x2c   : > { %p45_p4 = scmp.eq.s32.totalorder %s1361_s12, 0  ;;  %p1152_p6 = scmp.lt.s32.totalorder %s1361_s12, 2 }
  0x2d   : > { %s1511_s28 = scalar_select %p35_p2, %s1357_s11, %s37_s22  }
  0x2e   : > { %p46_p8 = por %p45_p4, %p44_p1  ;;  %p1818_p10 = scmp.eq.s32.totalorder %s1445_s13, 1 }
  0x2f   : > { %s306_s14 = sand.u32 1, %s1357_s11   ;;  %s928_s18 = sshll.u32 %s1361_s12, 7 }
  0x30   : > { %p1515_p12 = por %p1818_p10, %p44_p1  ;;  %s927_s21 = sshll.u32 %s306_s14, 3 }
  0x31   : > { %s1524_s26 = scalar_lea.hbm %s1796_s0, %s928_s18  ;;  %s310_s19 = scalar_lea.vmem [#allocation2], %s927_s21 }
  0x32   : > { %s317_s22 = sshll.u32 %s310_s19, 4  ;;  %p1526_p11 = pnand %p1152_p6, %p46_p8  ;;  %s1530_s22 = int_to_ptr.vmem [resolvable:$true] %s317_s22 }
  0x33   : > { %s307_s24 = scalar_lea.sflag [#allocation3], %s306_s14  ;;  %s1229_s25 = scalar_lea.hbm %s1524_s26, 128 }
  0x34   : > { %p1230_p13 = scmp.ne.s32.totalorder %s1524_s26, %s1229_s25  ;;  %p1231_p0 = pneg %p1526_p11 }
  0x35   : > { %s1234_s27 = scalar_lea.hbm %s1796_s0, 256  ;;  %p1235_p7 = scmp.lt.u32.totalorder %s1524_s26, %s1796_s0 }
  0x36   : > { %p1232_p3 = pnand %p1231_p0, %p1230_p13  ;;  %p1236_p9 = scmp.lt.u32.totalorder %s1234_s27, %s1229_s25 }
  0x37   : > { %p1238_p1 = scmp.lt.u32.totalorder %s1229_s25, %s1524_s26 }
  0x38   : > { %p1233_p5 = pneg %p1232_p3  ;;  %p1237_p2 = por %p1236_p9, %p1235_p7 }
  0x3a   : > { %p1239_p4 = por %p1238_p1, %p1237_p2 }
  0x3c   : > { %p1240_p6 = pnand %p1239_p4, %p1233_p5 }
  0x3e   : > { %1243 = shalt.err (!%p1240_p6)
}
  0x3f   : > { %s1244_s14 = scalar_lea.vmem %s1530_s22, 128  ;;  %s1366_s19 = smov [#allocation2]  }
  0x40   : > { %p1245_p8 = scmp.ne.s32.totalorder %s1530_s22, %s1244_s14  ;;  %s1249_s16 = sshll.u32 %s1366_s19, 4  ;;  %s1250_s16 = int_to_ptr.vmem [resolvable:$false] %s1249_s16 }
  0x41   : > { %s1251_s21 = scalar_lea.vmem %s1250_s16, 256  ;;  %p1252_p3 = scmp.lt.s32.totalorder %s1530_s22, %s1250_s16 }
  0x42   : > { %p1247_p10 = pnand %p1245_p8, %p1231_p0  ;;  %p1253_p7 = scmp.lt.s32.totalorder %s1251_s21, %s1244_s14 }
  0x44   : > { %p1248_p13 = pneg %p1247_p10  ;;  %p1254_p9 = por %p1253_p7, %p1252_p3 }
  0x46   : > { %p1255_p2 = pnand %p1254_p9, %p1248_p13 }
  0x48   : > { %1258 = shalt.err (!%p1255_p2)
}
  0x49   : > { %1143 = dma.hbm_to_vmem [thread:$0]  (!%p1526_p11), %s1524_s26, 128, %s1530_s22, %s307_s24  }
  0x4a   : > { %p1821_p5 = scmp.ne.s32.totalorder %s1815_s17, 0 }
  0x4b   : > { %s1560_s25 = sand.u32 (!%p1821_p5), 1, %s1353_s10   ;;  %p1822_p0 = scmp.ne.s32.totalorder (!%p1821_p5), %s1812_s15, 0 }
  0x4c   : > { %333 = sbr.rel (%p1821_p5) target bundleno = 1291 (0x50b), region = 52  ;;  %s1563_s27 = sshll.u32 (!%p1821_p5), %s1560_s25, 3 }
  0x4d   : > { %s336_s18 = scalar_lea.sflag (!%p1821_p5), [#allocation3], %s1560_s25 }
  0x53   : > { %1332 = dma.done.wait (%p1822_p0), %s336_s18, 128  }
  0x54   : > { %1334 = vsyncadd (%p1822_p0), %s336_s18, 4294967168  ;;  %p1823_p11 = scmp.eq.s32.totalorder %s1445_s13, 0 }
  0x56   : > { %1336 = dma.done.wait (%p1823_p11), [#allocation6], 512   ;;  %p1824_p1 = pmov %p1823_p11 }
  0x57   : > { %p387_p4 = scmp.lt.s32.totalorder %s1445_s13, 1  ;;  %v1367_v0 = vmov 0.0|0.0   ;;  %vm1368_vm0 = vmmov 0   ;;  %v1369_v1 = vmov 0.0   ;;  %v392_v2 = vld [vmem:[%s1797_s1] sm:$0xff]  ;;  %v393_v3 = vld [vmem:[%s1797_s1 + $0x8] sm:$0xff] }
  0x58   : > { %1338 = vsyncadd (%p1824_p1), [#allocation6], 4294966784  ;;  %1072 = vmatprep.subr.bf16.mxu0 %v1367_v0  ;;  %1018 = vmatprep.mubr.msk.f32.mxu0 %vm1368_vm0, %v1369_v1  ;;  %v394_v4 = vld [vmem:[%s1797_s1 + $0x10] sm:$0xff]  ;;  %v1073_v5 = vpack.c.bf16 %v393_v3, %v392_v2  ;;  %v395_v6 = vld [vmem:[%s1797_s1 + $0x18] sm:$0xff]  ;;  %s1370_s14 = smov 32   ;;  %s1825_s23 = scalar_lea.vmem [#allocation2], %s1563_s27 }
  0x59   : > { %s388_s17 = scalar_select %p387_p4, %s1445_s13, 1  ;;  %1096 = vmatprep.subr.bf16.mxu1 %v1367_v0  ;;  %1029 = vmatprep.mubr.msk.f32.mxu1 %vm1368_vm0, %v1369_v1  ;;  %v1076_v7 = vpack.c.bf16 %v395_v6, %v394_v4  ;;  %v396_v8 = vld [vmem:[%s1797_s1 + $0x20] sm:$0xff]  ;;  %v397_v9 = vld [vmem:[%s1797_s1 + $0x28] sm:$0xff]  ;;  %v398_v12 = vld [vmem:[%s1797_s1 + $0x30] sm:$0xff]  ;;  %vm509_vm1 = vcmask 261120   ;;  %vm762_vm2 = vcmask 523264  }
  0x5a   : > { %1074 = vmatpush3.bf16.msra.mxu0 %v1073_v5  ;;  %v1079_v11 = vpack.c.bf16 %v397_v9, %v396_v8  ;;  %v399_v13 = vld [vmem:[%s1797_s1 + $0x38] sm:$0xff]  ;;  %v400_v15 = vld [vmem:[%s1797_s1 + $0x40] sm:$0xff]  ;;  %v401_v16 = vld [vmem:[%s1797_s1 + $0x48] sm:$0xff]  ;;  %vm764_vm3 = vcmask 785408   ;;  %vm677_vm4 = vcmask 64512   ;;  %s941_s18 = sshll.u32 %s1445_s13, 7 }
  0x5b   : > { %s934_s15 = sshll.u32 %s388_s17, 3  ;;  %1075 = vmatprep.subr.bf16.mxu0 %v1367_v0  ;;  %v1082_v14 = vpack.c.bf16 %v399_v13, %v398_v12  ;;  %v1085_v17 = vpack.c.bf16 %v401_v16, %v400_v15  ;;  %v402_v18 = vld [vmem:[%s1797_s1 + $0x50] sm:$0xff]  ;;  %v403_v19 = vld [vmem:[%s1797_s1 + $0x58] sm:$0xff]  ;;  %v404_v21 = vld [vmem:[%s1797_s1 + $0x60] sm:$0xff]  ;;  %s768_s24 = scalar_lea.sflag [#allocation4], %s1560_s25 }
  0x5c   : > { %s390_s17 = scalar_lea.vmem %s1799_s3, %s934_s15  ;;  %v1088_v20 = vpack.c.bf16 %v403_v19, %v402_v18  ;;  %v405_v22 = vld [vmem:[%s1797_s1 + $0x68] sm:$0xff]  ;;  %v406_v24 = vld [vmem:[%s1797_s1 + $0x70] sm:$0xff]  ;;  %v407_v25 = vld [vmem:[%s1797_s1 + $0x78] sm:$0xff]  ;;  %s1371_s15 = smov 96  }
  0x5d   : > { %v487_v10 = vld [vmem:[%s390_s17] sm:$0xff]  ;;  %v1091_v23 = vpack.c.bf16 %v405_v22, %v404_v21  ;;  %v1094_v26 = vpack.c.bf16 %v407_v25, %v406_v24  ;;  %v498_v28 = vld [vmem:[#allocation5] sm:$0xff]  ;;  %v499_v29 = vld [vmem:[#allocation5 + $0x8] sm:$0xff] }
  0x5e   : > { %489 = vrot.lane.b32.xlu0 %v487_v10, %s1370_s14  ;;  %1077 = vmatpush3.bf16.msra.mxu0 %v1076_v7  ;;  %v391_v27 = vld [vmem:[%s1825_s23] sm:$0xff]  ;;  %v1097_v31 = vpack.c.bf16 %v499_v29, %v498_v28  ;;  %v590_v46 = vld [vmem:[%s1802_s6 + $0x10] sm:$0xff]  ;;  %v591_v48 = vld [vmem:[%s1802_s6 + $0x18] sm:$0xff]  ;;  %s1726_s23 = scalar_lea.hbm %s1804_s8, %s941_s18 }
  0x5f   : > { %1078 = vmatprep.subr.bf16.mxu0 %v1367_v0  ;;  %v500_v30 = vld [vmem:[#allocation5 + $0x10] sm:$0xff]  ;;  %v501_v32 = vld [vmem:[#allocation5 + $0x18] sm:$0xff]  ;;  %v1106_v49 = vpack.c.bf16 %v591_v48, %v590_v46  ;;  %v594_v53 = vld [vmem:[%s1802_s6 + $0x30] sm:$0xff] }
  0x60   : > { %1098 = vmatpush3.bf16.msra.mxu1 %v1097_v31  ;;  %v1100_v33 = vpack.c.bf16 %v501_v32, %v500_v30  ;;  %v935_v34 = vld [vmem:[%s1798_s2] ss:$0 sm:$0xff]  ;;  %v589_v45 = vld [vmem:[%s1802_s6 + $0x8] sm:$0xff]  ;;  %v595_v54 = vld [vmem:[%s1802_s6 + $0x38] sm:$0xff] }
  0x61   : > { %1099 = vmatprep.subr.bf16.mxu1 %v1367_v0  ;;  %v588_v44 = vld [vmem:[%s1802_s6] sm:$0xff]  ;;  %v593_v51 = vld [vmem:[%s1802_s6 + $0x28] sm:$0xff]  ;;  %v1112_v55 = vpack.c.bf16 %v595_v54, %v594_v53  ;;  %v598_v63 = vld [vmem:[%s1802_s6 + $0x50] sm:$0xff] }
  0x62   : > { %1080 = vmatpush3.bf16.msra.mxu0 %v1079_v11  ;;  %v1103_v47 = vpack.c.bf16 %v589_v45, %v588_v44  ;;  %v592_v50 = vld [vmem:[%s1802_s6 + $0x20] sm:$0xff]  ;;  %v597_v61 = vld [vmem:[%s1802_s6 + $0x48] sm:$0xff]  ;;  %v602_v6 = vld [vmem:[%s1802_s6 + $0x70] sm:$0xff] }
  0x63   : > { %1081 = vmatprep.subr.bf16.mxu0 %v1367_v0  ;;  %v1109_v52 = vpack.c.bf16 %v593_v51, %v592_v50  ;;  %v936_v56 = vld [vmem:[%s1801_s5] ss:$0 sm:$0xff]  ;;  %v601_v4 = vld [vmem:[%s1802_s6 + $0x68] sm:$0xff]  ;;  %v603_v7 = vld [vmem:[%s1802_s6 + $0x78] sm:$0xff] }
  0x64   : > { %1101 = vmatpush3.bf16.msra.mxu1 %v1100_v33  ;;  %v596_v60 = vld [vmem:[%s1802_s6 + $0x40] sm:$0xff]  ;;  %v1124_v8 = vpack.c.bf16 %v603_v7, %v602_v6 }
  0x65   : > { %1102 = vmatprep.subr.bf16.mxu1 %v1367_v0  ;;  %v1115_v62 = vpack.c.bf16 %v597_v61, %v596_v60  ;;  %v600_v3 = vld [vmem:[%s1802_s6 + $0x60] sm:$0xff] }
  0x66   : > { %1083 = vmatpush3.bf16.msra.mxu0 %v1082_v14  ;;  %v1121_v5 = vpack.c.bf16 %v601_v4, %v600_v3 }
  0x67   : > { %1084 = vmatprep.subr.bf16.mxu0 %v1367_v0 }
  0x6a   : > { %1086 = vmatpush3.bf16.msra.mxu0 %v1085_v17 }
  0x6b   : > { %1087 = vmatprep.subr.bf16.mxu0 %v1367_v0 }
  0x6e   : > { %1089 = vmatpush3.bf16.msra.mxu0 %v1088_v20 }
  0x6f   : > { %1090 = vmatprep.subr.bf16.mxu0 %v1367_v0 }
  0x72   : > { %1092 = vmatpush3.bf16.msra.mxu0 %v1091_v23 }
  0x73   : > { %1093 = vmatprep.subr.bf16.mxu0 %v1367_v0 }
  0x76   : > { %1095 = vmatpush3.bf16.msra.mxu0 %v1094_v26 }
  0x77   : > { %1067 = vmatprep.subr.mxu0 %v1369_v1 }
  0x79   : > { %1019 = vmatmul.mubr.f32.vlgmr.msra.gmra.mrb[0].mxu0 %v391_v27 }
  0x7a   : > { %1069 = vmatprep.mubr.msk.f32.mxu0 %vm1368_vm0, %v1369_v1 }
  0xd0   : > { %v490_v39 = vpop.permute.xlu0 %489 }
 0x14c   : > { %v481_v35 = vpop.f32.mrb[0].mxu0 }
 0x14d   : > { %v482_v36 = vadd.f32 %v935_v34, %v481_v35  ;;  %v1020_v37 = vpop.f32.mrb[1].mxu0 }
 0x14f   : > { %v485_v38 = vmul.f32 1.442695, %v482_v36 }
 0x151   : > { %1195 = vpow2.f32 %v485_v38 }
 0x15b   : > { %v1196_v40 = vpop.eup %1195 }
 0x15c   : > { %v492_v41 = vmul.f32 %v1196_v40, %v490_v39 }
 0x15e   : > { %494 = vrot.lane.b32.xlu0 %v492_v41, %s1371_s15  ;;  %s1372_s15 = smov [#allocation7]  }
 0x15f   : > { %s1263_s19 = sshll.u32 %s1372_s15, 4  ;;  %s1264_s19 = int_to_ptr.vmem [resolvable:$false] %s1263_s19 }
 0x160   : > { %s1265_s16 = scalar_lea.vmem %s1264_s19, 256 }
 0x162   : > { %758 = vrot.lane.b32.xlu0 %v1196_v40, %s1370_s14 }
 0x1d0   : > { %v495_v42 = vpop.permute.xlu0 %494 }
 0x1d1   : > { %v497_v43 = vadd.f32 %v495_v42, %v482_v36 }
 0x1d3   : > { %1030 = vmatmul.mubr.msk.f32.vlgmr.msra.gmra.mrb[0].mxu1 %vm509_vm1, %v497_v43 }
 0x1d4   : > { %1064 = vmatprep.mubr.msk.f32.mxu1 %vm1368_vm0, %v1369_v1  ;;  %1104 = vmatpush3.bf16.msra.mxu1 %v1103_v47  ;;  %v599_v1 = vld [vmem:[%s1802_s6 + $0x58] sm:$0xff]  ;;  %v759_v13 = vpop.permute.xlu0 %758 }
 0x1d5   : > { %1105 = vmatprep.subr.bf16.mxu1 %v1367_v0  ;;  %v1118_v2 = vpack.c.bf16 %v599_v1, %v598_v63 }
 0x1d8   : > { %1107 = vmatpush3.bf16.msra.mxu1 %v1106_v49 }
 0x1d9   : > { %1108 = vmatprep.subr.bf16.mxu1 %v1367_v0 }
 0x1dc   : > { %1110 = vmatpush3.bf16.msra.mxu1 %v1109_v52 }
 0x1dd   : > { %1111 = vmatprep.subr.bf16.mxu1 %v1367_v0 }
 0x1e0   : > { %1113 = vmatpush3.bf16.msra.mxu1 %v1112_v55 }
 0x1e1   : > { %1114 = vmatprep.subr.bf16.mxu1 %v1367_v0 }
 0x1e4   : > { %1116 = vmatpush3.bf16.msra.mxu1 %v1115_v62 }
 0x1e5   : > { %1117 = vmatprep.subr.bf16.mxu1 %v1367_v0 }
 0x1e8   : > { %1119 = vmatpush3.bf16.msra.mxu1 %v1118_v2 }
 0x1e9   : > { %1120 = vmatprep.subr.bf16.mxu1 %v1367_v0 }
 0x1ec   : > { %1122 = vmatpush3.bf16.msra.mxu1 %v1121_v5 }
 0x1ed   : > { %1123 = vmatprep.subr.bf16.mxu1 %v1367_v0  ;;  %v676_v0 = vld [vmem:[%s1803_s7] sm:$0xff] }
 0x1ee   : > { %1068 = vmatpush3.msra.mxu0 %v676_v0 }
 0x1f0   : > { %1125 = vmatpush3.bf16.msra.mxu1 %v1124_v8 }
 0x2a6   : > { %v579_v57 = vpop.f32.mrb[0].mxu1 }
 0x2a7   : > { %v580_v58 = vadd.f32 %v936_v56, %v579_v57  ;;  %v1031_v59 = vpop.f32.mrb[1].mxu1 }
 0x2a9   : > { %583 = vmax.xlane.f32.xlu1 %v580_v58 }
 0x2ba   : > { %754 = vrot.lane.b32.xlu1 %v482_v36, %s1370_s14  ;;  %s379_s14 = scalar_lea.vmem [#allocation7], %s1563_s27 }
 0x2bb   : > { %s786_s17 = sshll.u32 %s379_s14, 4  ;;  %s787_s17 = int_to_ptr.vmem [resolvable:$true] %s786_s17 }
 0x2bc   : > { %s1259_s20 = scalar_lea.vmem %s787_s17, 128  ;;  %p1266_p13 = scmp.lt.s32.totalorder %s787_s17, %s1264_s19 }
 0x2bd   : > { %p1260_p6 = scmp.ne.s32.totalorder %s787_s17, %s1259_s20  ;;  %p1267_p3 = scmp.lt.s32.totalorder %s1265_s16, %s1259_s20 }
 0x2bf   : > { %p1261_p8 = pnand %p1260_p6, %p1515_p12  ;;  %p1268_p7 = por %p1267_p3, %p1266_p13 }
 0x2c1   : > { %p1262_p10 = pneg %p1261_p8 }
 0x2c3   : > { %p1269_p9 = pnand %p1268_p7, %p1262_p10 }
 0x336   : > { %v584_v9 = vpop.xlane.xlu1 %583 }
 0x337   : > { %v585_v10 = vsub.f32 %v580_v58, %v584_v9 }
 0x339   : > { %v586_v11 = vmul.f32 1.442695, %v585_v10 }
 0x33a   : > { %v755_v12 = vpop.permute.xlu1 %754 }
 0x33b   : > { %1197 = vpow2.f32 %v586_v11  ;;  %v761_v14 = vsel %vm509_vm1, %v497_v43, %v755_v12 }
 0x33c   : > { %v763_v15 = vsel %vm762_vm2, %v761_v14, %v759_v13 }
 0x33d   : > { %v765_v16 = vsel %vm764_vm3, %v763_v15, 0.0 }
 0x33e   : > { %766 = vst [vmem:[%s379_s14] sm:$0xff] %v765_v16 }
 0x345   : > { %v1198_v17 = vpop.eup %1197 }
 0x346   : > { %1065 = vmatmul.mubr.f32.vlgmr.msra.gmra.mrb[2].mxu1 %v1198_v17 }
 0x419   : > { %v670_v18 = vpop.f32.mrb[2].mxu1 }
 0x41a   : > { %v674_v19 = vmax.f32 %v670_v18, 1e-30  ;;  %v1066_v20 = vpop.f32.mrb[3].mxu1 }
 0x41c   : > { %1199 = vrcp.f32 %v674_v19 }
 0x426   : > { %v1200_v21 = vpop.eup %1199 }
 0x427   : > { %1070 = vmatmul.mubr.msk.f32.vlgmr.msra.gmra.mrb[2].mxu0 %vm677_vm4, %v1200_v21 }
 0x428   : > { %1272 = shalt.err (!%p1269_p9)
}
 0x429   : > { %s1273_s14 = scalar_lea.hbm %s1726_s23, 128  ;;  %s1277_s22 = scalar_lea.hbm %s1804_s8, 256 }
 0x42a   : > { %p1274_p2 = scmp.ne.s32.totalorder %s1726_s23, %s1273_s14  ;;  %p1278_p11 = scmp.lt.u32.totalorder %s1726_s23, %s1804_s8 }
 0x42b   : > { %p1279_p1 = scmp.lt.u32.totalorder %s1277_s22, %s1273_s14  ;;  %p1281_p6 = scmp.lt.u32.totalorder %s1273_s14, %s1726_s23 }
 0x42c   : > { %p1275_p5 = pnand %p1274_p2, %p1515_p12 }
 0x42d   : > { %p1280_p4 = por %p1279_p1, %p1278_p11 }
 0x42e   : > { %p1276_p0 = pneg %p1275_p5 }
 0x42f   : > { %p1282_p8 = por %p1281_p6, %p1280_p4 }
 0x431   : > { %p1283_p10 = pnand %p1282_p8, %p1276_p0 }
 0x433   : > { %1286 = shalt.err (!%p1283_p10)
}
 0x434   : > { %1132 = dma.vmem_to_hbm [thread:$0]  (%p1515_p12), %s787_s17, 128, %s1726_s23, %s768_s24  }
 0x435   : > { %s386_s20 = scalar_lea.vmem [#allocation8], %s1563_s27  ;;  %s1752_s14 = scalar_lea.hbm %s1805_s9, %s941_s18 }
 0x436   : > { %s799_s16 = sshll.u32 %s386_s20, 4  ;;  %s773_s22 = scalar_lea.sflag [#allocation9], %s1560_s25  ;;  %s1754_s16 = int_to_ptr.vmem [resolvable:$true] %s799_s16 }
 0x437   : > { %s1287_s15 = scalar_lea.vmem %s1754_s16, 128  ;;  %s1373_s27 = smov [#allocation8]  }
 0x438   : > { %p1288_p13 = scmp.ne.s32.totalorder %s1754_s16, %s1287_s15  ;;  %s1291_s17 = sshll.u32 %s1373_s27, 4  ;;  %s1292_s17 = int_to_ptr.vmem [resolvable:$false] %s1291_s17 }
 0x439   : > { %s1293_s13 = scalar_lea.vmem %s1292_s17, 256  ;;  %p1294_p9 = scmp.lt.s32.totalorder %s1754_s16, %s1292_s17 }
 0x43a   : > { %p1289_p3 = pnand %p1288_p13, %p1515_p12  ;;  %p1295_p2 = scmp.lt.s32.totalorder %s1293_s13, %s1287_s15 }
 0x43c   : > { %p1290_p7 = pneg %p1289_p3  ;;  %p1296_p5 = por %p1295_p2, %p1294_p9 }
 0x43e   : > { %p1297_p0 = pnand %p1296_p5, %p1290_p7 }
 0x4fa   : > { %v747_v22 = vpop.f32.mrb[2].mxu0 }
 0x4fb   : > { %v751_v23 = vmul.f32 %v1198_v17, %v747_v22  ;;  %v1071_v24 = vpop.f32.mrb[3].mxu0 }
 0x4fd   : > { %752 = vst [vmem:[%s386_s20] sm:$0xff] %v751_v23 }
 0x4fe   : > { %1300 = shalt.err (!%p1297_p0)
}
 0x4ff   : > { %s1301_s25 = scalar_lea.hbm %s1752_s14, 128  ;;  %s1305_s24 = scalar_lea.hbm %s1805_s9, 256 }
 0x500   : > { %p1302_p11 = scmp.ne.s32.totalorder %s1752_s14, %s1301_s25  ;;  %p1306_p6 = scmp.lt.u32.totalorder %s1752_s14, %s1805_s9 }
 0x501   : > { %p1307_p8 = scmp.lt.u32.totalorder %s1305_s24, %s1301_s25  ;;  %p1309_p13 = scmp.lt.u32.totalorder %s1301_s25, %s1752_s14 }
 0x502   : > { %p1303_p1 = pnand %p1302_p11, %p1515_p12 }
 0x503   : > { %p1308_p10 = por %p1307_p8, %p1306_p6 }
 0x504   : > { %p1304_p4 = pneg %p1303_p1 }
 0x505   : > { %p1310_p3 = por %p1309_p13, %p1308_p10 }
 0x507   : > { %p1311_p7 = pnand %p1310_p3, %p1304_p4 }
 0x509   : > { %1314 = shalt.err (!%p1311_p7)
}
 0x50a   : > { %1133 = dma.vmem_to_hbm [thread:$0]  (%p1515_p12), %s1754_s16, 128, %s1752_s14, %s773_s22  }
 0x50b PF: > { %s1826_s21 = sld [smem:[#allocation14_spill]]  ;;  %s811_s26 = sand.u32 1, %s1349_s30  }
 0x50c   : > { %p1828_p2 = scmp.ge.s32.totalorder %s1361_s12, 2  ;;  %s812_s15 = scalar_lea.sflag [#allocation4], %s811_s26 }
 0x511   : > { %p1827_p9 = scmp.ne.s32.totalorder %s1826_s21, 0 }
 0x513   : > { %p1145_p5 = pnand %p1828_p2, %p1827_p9 }
 0x515   : > { %1340 = dma.done.wait (!%p1145_p5), %s812_s15, 128  }
 0x516   : > { %1342 = vsyncadd (!%p1145_p5), %s812_s15, 4294967168  ;;  %s821_s27 = scalar_lea.sflag [#allocation9], %s811_s26 }
 0x517   : > { %1344 = dma.done.wait (!%p1145_p5), %s821_s27, 128  }
 0x518   : > { %1346 = vsyncadd (!%p1145_p5), %s821_s27, 4294967168  ;;  %s1829_s12 = sld [smem:[#allocation15_spill]]  ;;  %s1830_s30 = smov %s1353_s10 }
 0x519   : > { %s1831_s10 = smov %s1357_s11  ;;  %s1832_s11 = smov %s1511_s28 }
 0x51e   : > { %p27_p12 = scmp.ge.s32.totalorder %s1829_s12, 4  }
 0x520   :  { %29 = sbr.rel (!%p27_p12) target bundleno = 8 (0x8), region = 121 }
 0x527   :  { %826 = vsyncpa [#allocation3], 1 }
 0x528   :  { %828 = vsyncpa [#allocation3 + $0x1], 1 }
 0x529   :  { %829 = vsyncpa [#allocation6], 1 }
 0x52a   :  { %830 = vsyncpa [#allocation4], 1 }
 0x52b   :  { %832 = vsyncpa [#allocation4 + $0x1], 1 }
 0x52c   :  { %833 = vsyncpa [#allocation9], 1 }
 0x52d   :  { %835 = vsyncpa [#allocation9 + $0x1], 1 }

</bundles_post_ra>
